<compile_context>
chip_gen: v7x
topology: tpu7x:2x2x1
jax: 0.10.0
libtpu: 0.0.40
codegen_flags: <defaults>
</compile_context>

<pallas_src>
import jax
import jax.numpy as jnp
from jax.experimental import pallas as pl
from jax.experimental.pallas import tpu as pltpu


def _mlp_kernel(x_ref, w1_ref, b1_ref, w2_ref, b2_ref, o_ref):
    # x/w1/w2 are bf16 (MXU-friendly); accumulate in f32, epilogue in f32.
    x = x_ref[...]
    h = jnp.dot(x, w1_ref[...], preferred_element_type=jnp.float32)
    h = jnp.maximum(h + b1_ref[...], 0.0)                       # bias + ReLU (f32 VPU)
    # TODO(synk): dropout is a no-op here (inference / training=False semantics)
    y = jnp.dot(h.astype(w2_ref.dtype), w2_ref[...],
                preferred_element_type=jnp.float32)
    y = y + b2_ref[...]
    # sigmoid(y) = 0.5 * (tanh(0.5*y) + 1): one EUP transcendental, no approx-recip.
    o_ref[...] = (0.5 * (jnp.tanh(0.5 * y) + 1.0)).astype(o_ref.dtype)


def _round_up(x, m):
    return ((x + m - 1) // m) * m


def _vmem_budget_bytes(tile_n, f_in_p, h_p, f_out_p):
    """Explicit VMEM budget from actual block sizes (double-buffered) + headroom."""
    block_bytes = (
        tile_n * f_in_p * 2        # x tile (bf16)
        + f_in_p * h_p * 2         # w1 (bf16)
        + 8 * h_p * 4              # b1 (f32, sublane-padded)
        + h_p * f_out_p * 2        # w2 (bf16)
        + 8 * f_out_p * 4          # b2 (f32, sublane-padded)
        + tile_n * f_out_p * 2     # out tile (bf16)
    )
    budget = 2 * block_bytes + (4 << 20)     # x2 double-buffer + Mosaic scratch headroom
    return min(max(budget, 8 << 20), 48 << 20)


def mlp_forward_padded(x, w1p, b1p, w2p, b2p, f_in, f_out, *, tile_n=512):
    """x: [N, f_in]; params are pre-padded (128-lane) / pre-cast kernel operands."""
    N = x.shape[0]
    F_in_p, H_p = w1p.shape
    F_out_p = w2p.shape[1]

    # Only per-call prep on x: bf16 cast + zero-pad feature dim to 128 lanes.
    if f_in != F_in_p:
        xp = jnp.zeros((N, F_in_p), jnp.bfloat16).at[:, :f_in].set(x.astype(jnp.bfloat16))
    else:
        xp = x.astype(jnp.bfloat16)

    tile_n = min(tile_n, _round_up(N, 8))
    grid = (pl.cdiv(N, tile_n),)   # ragged last block: OOB rows are masked on writeback

    out = pl.pallas_call(
        _mlp_kernel,
        out_shape=jax.ShapeDtypeStruct((N, F_out_p), jnp.bfloat16),
        grid=grid,
        in_specs=[
            pl.BlockSpec((tile_n, F_in_p), lambda i: (i, 0)),   # x tile, pipelined over N
            pl.BlockSpec((F_in_p, H_p), lambda i: (0, 0)),      # w1: VMEM-resident
            pl.BlockSpec((1, H_p), lambda i: (0, 0)),           # b1: VMEM-resident
            pl.BlockSpec((H_p, F_out_p), lambda i: (0, 0)),     # w2: VMEM-resident
            pl.BlockSpec((1, F_out_p), lambda i: (0, 0)),       # b2: VMEM-resident
        ],
        out_specs=pl.BlockSpec((tile_n, F_out_p), lambda i: (i, 0)),
        compiler_params=pltpu.CompilerParams(
            dimension_semantics=("parallel",),
            vmem_limit_bytes=_vmem_budget_bytes(tile_n, F_in_p, H_p, F_out_p),
        ),
    )(xp, w1p, b1p, w2p, b2p)
    return out[:, :f_out].astype(jnp.float32)


class MLPPallas:
    """Mirrors the PyTorch MLP module; forward returns (x.squeeze(),) * 3."""

    def __init__(self, in_feature, hidden, out_feature, dropout, key):
        k1, k2, k3, k4 = jax.random.split(key, 4)
        # deterministic init (uniform in +/- 1/sqrt(fan_in), like nn.Linear default)
        lim1 = 1.0 / (in_feature ** 0.5)
        lim2 = 1.0 / (hidden ** 0.5)
        self.w1 = jax.random.uniform(k1, (in_feature, hidden), jnp.float32, -lim1, lim1)
        self.b1 = jax.random.uniform(k2, (1, hidden), jnp.float32, -lim1, lim1)
        self.w2 = jax.random.uniform(k3, (hidden, out_feature), jnp.float32, -lim2, lim2)
        self.b2 = jax.random.uniform(k4, (1, out_feature), jnp.float32, -lim2, lim2)
        self.dropout_rate = dropout  # unused at inference

        # --- hoisted (one-time) kernel-operand preparation ------------------------
        # Zero padding preserves the math: padded input features hit zero weight rows,
        # padded hidden units get zero bias and zero w2 rows, padded outputs are
        # sliced off in the wrapper.
        self.f_in, self.hidden, self.f_out = in_feature, hidden, out_feature
        f_in_p = _round_up(in_feature, 128)
        h_p = _round_up(hidden, 128)
        f_out_p = _round_up(out_feature, 128)
        self.w1p = (jnp.zeros((f_in_p, h_p), jnp.bfloat16)
                    .at[:in_feature, :hidden].set(self.w1.astype(jnp.bfloat16)))
        self.b1p = (jnp.zeros((1, h_p), jnp.float32)
                    .at[:, :hidden].set(self.b1.astype(jnp.float32)))
        self.w2p = (jnp.zeros((h_p, f_out_p), jnp.bfloat16)
                    .at[:hidden, :out_feature].set(self.w2.astype(jnp.bfloat16)))
        self.b2p = (jnp.zeros((1, f_out_p), jnp.float32)
                    .at[:, :out_feature].set(self.b2.astype(jnp.float32)))

    def __call__(self, x):
        y = mlp_forward_padded(x, self.w1p, self.b1p, self.w2p, self.b2p,
                               self.f_in, self.f_out)
        y = jnp.squeeze(y)
        return (y, y, y)


if __name__ == "__main__":
    key = jax.random.PRNGKey(0)
    k_param, k_x = jax.random.split(key)

    N, F_IN, HIDDEN, F_OUT = 8, 16, 32, 1
    model = MLPPallas(F_IN, HIDDEN, F_OUT, dropout=0.5, key=k_param)

    x = jax.random.normal(k_x, (N, F_IN), dtype=jnp.float32)
    out1, out2, out3 = model(x)
    jax.block_until_ready((out1, out2, out3))

    # sanity check against plain-JAX f32 reference (bf16 matmuls + bf16 output -> looser tol)
    ref = jax.nn.sigmoid(
        jnp.maximum(x @ model.w1 + model.b1, 0.0) @ model.w2 + model.b2
    ).squeeze()
    assert out1.shape == ref.shape == (N,)
    assert jnp.allclose(out1, ref, atol=2e-2), "mismatch vs reference"
    print("KERNEL_OK")
</pallas_src>

<mosaic_0001>
module attributes {stable_mosaic.version = 11 : i64} {
  func.func @_mlp_kernel(%arg0: i32, %arg1: memref<8x128xbf16, #tpu.memory_space<vmem>>, %arg2: memref<128x128xbf16, #tpu.memory_space<vmem>>, %arg3: memref<1x128xf32, #tpu.memory_space<vmem>>, %arg4: memref<128x128xbf16, #tpu.memory_space<vmem>>, %arg5: memref<1x128xf32, #tpu.memory_space<vmem>>, %arg6: memref<8x128xbf16, #tpu.memory_space<vmem>>) attributes {dimension_semantics = [#tpu.dimension_semantics<parallel>], iteration_bounds = array<i64: 1>, scalar_prefetch = 0 : i64, scratch_operands = 0 : i64, tpu.core_type = #tpu.core_type<tc>, window_params = [{transform_indices = @transform_0, window_bounds = array<i64: 8, 128>}, {pipeline_mode = #tpu.pipeline_mode<synchronous>, transform_indices = @transform_1, window_bounds = array<i64: 128, 128>}, {pipeline_mode = #tpu.pipeline_mode<synchronous>, transform_indices = @transform_2, window_bounds = array<i64: 1, 128>}, {pipeline_mode = #tpu.pipeline_mode<synchronous>, transform_indices = @transform_3, window_bounds = array<i64: 128, 128>}, {pipeline_mode = #tpu.pipeline_mode<synchronous>, transform_indices = @transform_4, window_bounds = array<i64: 1, 128>}, {transform_indices = @transform_5, window_bounds = array<i64: 8, 128>}]} {
    %c0 = arith.constant 0 : index
    %c0_0 = arith.constant 0 : index
    %0 = vector.load %arg1[%c0, %c0_0] : memref<8x128xbf16, #tpu.memory_space<vmem>>, vector<8x128xbf16>
    %c0_1 = arith.constant 0 : index
    %c0_2 = arith.constant 0 : index
    %1 = vector.load %arg2[%c0_1, %c0_2] : memref<128x128xbf16, #tpu.memory_space<vmem>>, vector<128x128xbf16>
    %cst = arith.constant dense<0.000000e+00> : vector<8x128xf32>
    %2 = tpu.matmul %0, %1, %cst {dimension_numbers = #tpu.dot_dimension_numbers<[1], [0], [0], [1], [0, 0, 1, 1], [], []>} : vector<8x128xbf16>, vector<128x128xbf16>, vector<8x128xf32> -> vector<8x128xf32>
    %c0_3 = arith.constant 0 : index
    %c0_4 = arith.constant 0 : index
    %3 = vector.load %arg3[%c0_3, %c0_4] : memref<1x128xf32, #tpu.memory_space<vmem>>, vector<1x128xf32>
    %4 = vector.broadcast %3 : vector<1x128xf32> to vector<8x128xf32>
    %5 = arith.addf %2, %4 : vector<8x128xf32>
    %cst_5 = arith.constant 0.000000e+00 : f32
    %6 = vector.broadcast %cst_5 : f32 to vector<8x128xf32>
    %7 = arith.maximumf %5, %6 : vector<8x128xf32>
    %8 = arith.truncf %7 : vector<8x128xf32> to vector<8x128xbf16>
    %c0_6 = arith.constant 0 : index
    %c0_7 = arith.constant 0 : index
    %9 = vector.load %arg4[%c0_6, %c0_7] : memref<128x128xbf16, #tpu.memory_space<vmem>>, vector<128x128xbf16>
    %cst_8 = arith.constant dense<0.000000e+00> : vector<8x128xf32>
    %10 = tpu.matmul %8, %9, %cst_8 {dimension_numbers = #tpu.dot_dimension_numbers<[1], [0], [0], [1], [0, 0, 1, 1], [], []>} : vector<8x128xbf16>, vector<128x128xbf16>, vector<8x128xf32> -> vector<8x128xf32>
    %c0_9 = arith.constant 0 : index
    %c0_10 = arith.constant 0 : index
    %11 = vector.load %arg5[%c0_9, %c0_10] : memref<1x128xf32, #tpu.memory_space<vmem>>, vector<1x128xf32>
    %12 = vector.broadcast %11 : vector<1x128xf32> to vector<8x128xf32>
    %13 = arith.addf %10, %12 : vector<8x128xf32>
    %cst_11 = arith.constant 5.000000e-01 : f32
    %14 = vector.broadcast %cst_11 : f32 to vector<8x128xf32>
    %15 = arith.mulf %14, %13 : vector<8x128xf32>
    %16 = math.tanh %15 : vector<8x128xf32>
    %cst_12 = arith.constant 1.000000e+00 : f32
    %17 = vector.broadcast %cst_12 : f32 to vector<8x128xf32>
    %18 = arith.addf %16, %17 : vector<8x128xf32>
    %cst_13 = arith.constant 5.000000e-01 : f32
    %19 = vector.broadcast %cst_13 : f32 to vector<8x128xf32>
    %20 = arith.mulf %19, %18 : vector<8x128xf32>
    %21 = arith.truncf %20 : vector<8x128xf32> to vector<8x128xbf16>
    %c0_14 = arith.constant 0 : index
    %c0_15 = arith.constant 0 : index
    %22 = vector.load %arg6[%c0_14, %c0_15] : memref<8x128xbf16, #tpu.memory_space<vmem>>, vector<8x128xbf16>
    tpu.vector_store %arg6[%c0_14, %c0_15], %21 {strides = array<i32>} : memref<8x128xbf16, #tpu.memory_space<vmem>>, vector<8x128xbf16>,
    return
  }
  func.func @transform_0(%arg0: i32) -> (i32, i32) {
    %c0_i32 = arith.constant 0 : i32
    %c0_i32_0 = arith.constant 0 : i32
    return %arg0, %c0_i32 : i32, i32
  }
  func.func @transform_1(%arg0: i32) -> (i32, i32) {
    %c0_i32 = arith.constant 0 : i32
    %c0_i32_0 = arith.constant 0 : i32
    %c0_i32_1 = arith.constant 0 : i32
    return %c0_i32, %c0_i32_0 : i32, i32
  }
  func.func @transform_2(%arg0: i32) -> (i32, i32) {
    %c0_i32 = arith.constant 0 : i32
    %c0_i32_0 = arith.constant 0 : i32
    %c0_i32_1 = arith.constant 0 : i32
    return %c0_i32, %c0_i32_0 : i32, i32
  }
  func.func @transform_3(%arg0: i32) -> (i32, i32) {
    %c0_i32 = arith.constant 0 : i32
    %c0_i32_0 = arith.constant 0 : i32
    %c0_i32_1 = arith.constant 0 : i32
    return %c0_i32, %c0_i32_0 : i32, i32
  }
  func.func @transform_4(%arg0: i32) -> (i32, i32) {
    %c0_i32 = arith.constant 0 : i32
    %c0_i32_0 = arith.constant 0 : i32
    %c0_i32_1 = arith.constant 0 : i32
    return %c0_i32, %c0_i32_0 : i32, i32
  }
  func.func @transform_5(%arg0: i32) -> (i32, i32) {
    %c0_i32 = arith.constant 0 : i32
    %c0_i32_0 = arith.constant 0 : i32
    return %arg0, %c0_i32 : i32, i32
  }
}

</mosaic_0001>

<bundles_post_ra>
// kernel: tpu_custom_call.1
= control target key start
LH: loop header
LB: loop body
LE: loop exit
PB: predicated region body
PF: predicated region fallthrough
CT: control target
= control target key end

     0   :  { %10 = vsyncpa [#allocation3], 0  ;;  %s602_s0 = inlined_call_operand.hbm [shape: bf16[8,128], index: 0, kind: input, shape index: {}]   ;;  %s603_s1 = inlined_call_operand.hbm [shape: bf16[128,128], index: 1, kind: input, shape index: {}]   ;;  %s604_s2 = inlined_call_operand.vmem [shape: f32[1,128], index: 2, kind: input, shape index: {}]   ;;  %s605_s3 = inlined_call_operand.hbm [shape: bf16[128,128], index: 3, kind: input, shape index: {}]   ;;  %s606_s4 = inlined_call_operand.vmem [shape: f32[1,128], index: 4, kind: input, shape index: {}]   ;;  %s607_s5 = inlined_call_operand.hbm [shape: bf16[8,128], index: 5, kind: output, shape index: {}]  }
   0x1   :  { %11 = vsyncpa [#allocation6], 0 }
   0x2   :  { %12 = vsyncpa [#allocation4], 0  ;;  %s504_s18 = smov [#allocation5]   ;;  %s410_s22 = scalar_lea.hbm %s603_s1, 1024 }
   0x3   :  { %s28_s19 = sshll.u32 %s504_s18, 4  ;;  %p411_p0 = scmp.ne.s32.totalorder %s603_s1, %s410_s22  ;;  %s29_s19 = int_to_ptr.vmem [resolvable:$true] %s28_s19 }
   0x4   :  { %p414_p1 = scmp.lt.u32.totalorder %s410_s22, %s603_s1 }
   0x6   :  { %p416_p2 = pnand %p414_p1, %p411_p0 }
   0x8   :  { %419 = shalt.err (!%p416_p2)
}
   0x9   :  { %s420_s27 = scalar_lea.vmem %s29_s19, 1024  ;;  %p425_p4 = scmp.lt.s32.totalorder %s29_s19, %s29_s19 }
   0xa   :  { %p421_p3 = scmp.ne.s32.totalorder %s29_s19, %s420_s27  ;;  %p426_p5 = scmp.lt.s32.totalorder %s420_s27, %s420_s27 }
   0xc   :  { %p427_p6 = por %p426_p5, %p425_p4 }
   0xe   :  { %p428_p7 = pnand %p427_p6, %p421_p3 }
  0x10   :  { %431 = shalt.err (!%p428_p7)
}
  0x11   :  { %s505_s28 = smov 64   ;;  %s506_s29 = smov 4  }
  0x12   :  { %34 = dma.hbm_to_vmem [thread:$0]  %s603_s1, 1024, %s29_s19, [#allocation6], %s505_s28, %s505_s28, %s506_s29  }
  0x13   :  { %s507_s7 = smov [#allocation2]   ;;  %s508_s9 = smov [#allocation7]  }
  0x14   :  { %s19_s8 = sshll.u32 %s507_s7, 4  ;;  %s42_s10 = sshll.u32 %s508_s9, 4  ;;  %s20_s8 = int_to_ptr.vmem [resolvable:$true] %s19_s8  ;;  %s43_s10 = int_to_ptr.vmem [resolvable:$true] %s42_s10 }
  0x15   :  { %s432_s13 = scalar_lea.hbm %s602_s0, 64 }
  0x16   :  { %p433_p8 = scmp.ne.s32.totalorder %s602_s0, %s432_s13  ;;  %p436_p9 = scmp.lt.u32.totalorder %s432_s13, %s602_s0 }
  0x18   :  { %p438_p10 = pnand %p436_p9, %p433_p8 }
  0x1a   :  { %441 = shalt.err (!%p438_p10)
}
  0x1b   :  { %s442_s1 = scalar_lea.vmem %s20_s8, 64  ;;  %p447_p12 = scmp.lt.s32.totalorder %s20_s8, %s20_s8 }
  0x1c   :  { %p443_p11 = scmp.ne.s32.totalorder %s20_s8, %s442_s1  ;;  %p448_p13 = scmp.lt.s32.totalorder %s442_s1, %s442_s1 }
  0x1e   :  { %p449_p0 = por %p448_p13, %p447_p12 }
  0x20   :  { %p450_p1 = pnand %p449_p0, %p443_p11 }
  0x22   :  { %453 = shalt.err (!%p450_p1)
}
  0x23   :  { %22 = dma.hbm_to_vmem [thread:$0]  %s602_s0, 64, %s20_s8, [#allocation3]  }
  0x24   :  { %s454_s22 = scalar_lea.hbm %s605_s3, 1024 }
  0x25   :  { %p455_p2 = scmp.ne.s32.totalorder %s605_s3, %s454_s22  ;;  %p458_p3 = scmp.lt.u32.totalorder %s454_s22, %s605_s3 }
  0x27   :  { %p460_p4 = pnand %p458_p3, %p455_p2 }
  0x29   :  { %463 = shalt.err (!%p460_p4)
}
  0x2a   :  { %s464_s27 = scalar_lea.vmem %s43_s10, 1024  ;;  %p469_p6 = scmp.lt.s32.totalorder %s43_s10, %s43_s10 }
  0x2b   :  { %p465_p5 = scmp.ne.s32.totalorder %s43_s10, %s464_s27  ;;  %p470_p7 = scmp.lt.s32.totalorder %s464_s27, %s464_s27 }
  0x2d   :  { %p471_p8 = por %p470_p7, %p469_p6 }
  0x2f   :  { %p472_p9 = pnand %p471_p8, %p465_p5 }
  0x31   :  { %475 = shalt.err (!%p472_p9)
}
  0x32   :  { %48 = dma.hbm_to_vmem [thread:$0]  %s605_s3, 1024, %s43_s10, [#allocation6], %s505_s28, %s505_s28, %s506_s29  }
  0x33   :  { %498 = dma.done.wait [#allocation3], 64  }
  0x34   :  { %499 = vsyncadd [#allocation3], 4294967232 }
  0x35   :  { %500 = dma.done.wait [#allocation6], 2048  }
  0x36   :  { %501 = vsyncadd [#allocation6], 4294965248  ;;  %v509_v0 = vmov 0.0   ;;  %vm510_vm0 = vmmov 0   ;;  %v392_v1 = vld [vmem:[#allocation5] sm:$0xff]   ;;  %v393_v2 = vld [vmem:[#allocation5 + $0x8] sm:$0xff]  }
  0x37   :  { %344 = vmatprep.subr.bf16.mxu0 %v509_v0  ;;  %360 = vmatprep.mubr.msk.bf16.mxu0 %vm510_vm0, %v509_v0  ;;  %v394_v3 = vld [vmem:[#allocation5 + $0x10] sm:$0xff]   ;;  %v400_v4 = vld [vmem:[#allocation7] sm:$0xff]   ;;  %v395_v5 = vld [vmem:[#allocation5 + $0x18] sm:$0xff]  }
  0x38   :  { %364 = vmatprep.subr.bf16.mxu1 %v509_v0  ;;  %380 = vmatprep.mubr.msk.bf16.mxu1 %vm510_vm0, %v509_v0  ;;  %v401_v6 = vld [vmem:[#allocation7 + $0x8] sm:$0xff]   ;;  %v396_v7 = vld [vmem:[#allocation5 + $0x20] sm:$0xff]   ;;  %v402_v8 = vld [vmem:[#allocation7 + $0x10] sm:$0xff]  }
  0x39   :  { %345 = vmatpush3.bf16.msra.mxu0 %v392_v1  ;;  %365 = vmatpush3.bf16.msra.mxu1 %v400_v4  ;;  %v397_v9 = vld [vmem:[#allocation5 + $0x28] sm:$0xff]   ;;  %v403_v10 = vld [vmem:[#allocation7 + $0x18] sm:$0xff]   ;;  %v398_v11 = vld [vmem:[#allocation5 + $0x30] sm:$0xff]  }
  0x3a   :  { %346 = vmatprep.subr.bf16.mxu0 %v509_v0  ;;  %366 = vmatprep.subr.bf16.mxu1 %v509_v0  ;;  %v404_v12 = vld [vmem:[#allocation7 + $0x20] sm:$0xff]   ;;  %v399_v13 = vld [vmem:[#allocation5 + $0x38] sm:$0xff]   ;;  %v405_v14 = vld [vmem:[#allocation7 + $0x28] sm:$0xff]  }
  0x3b   :  { %v61_v15 = vld [vmem:[#allocation2] sm:$0xf]  ;;  %v406_v16 = vld [vmem:[#allocation7 + $0x30] sm:$0xff]  }
  0x3c   :  { %v407_v17 = vld [vmem:[#allocation7 + $0x38] sm:$0xff]  }
  0x3d   :  { %347 = vmatpush3.bf16.msra.mxu0 %v393_v2  ;;  %367 = vmatpush3.bf16.msra.mxu1 %v401_v6  ;;  %v308_v18 = vld [vmem:[%s604_s2] ss:$0 sm:$0xff]  ;;  %s511_s2 = smov [#allocation8]  }
  0x3e   :  { %348 = vmatprep.subr.bf16.mxu0 %v509_v0  ;;  %368 = vmatprep.subr.bf16.mxu1 %v509_v0  ;;  %v317_v26 = vld [vmem:[%s606_s4] ss:$0 sm:$0xff]  ;;  %s298_s7 = sshll.u32 %s511_s2, 4  ;;  %s299_s7 = int_to_ptr.vmem [resolvable:$true] %s298_s7 }
  0x3f   :  { %s476_s8 = scalar_lea.vmem %s299_s7, 64  ;;  %p481_p11 = scmp.lt.s32.totalorder %s299_s7, %s299_s7 }
  0x40   :  { %p477_p10 = scmp.ne.s32.totalorder %s299_s7, %s476_s8  ;;  %p482_p12 = scmp.lt.s32.totalorder %s476_s8, %s476_s8 }
  0x41   :  { %349 = vmatpush3.bf16.msra.mxu0 %v394_v3  ;;  %369 = vmatpush3.bf16.msra.mxu1 %v402_v8 }
  0x42   :  { %350 = vmatprep.subr.bf16.mxu0 %v509_v0  ;;  %370 = vmatprep.subr.bf16.mxu1 %v509_v0  ;;  %p483_p13 = por %p482_p12, %p481_p11 }
  0x44   :  { %p484_p0 = pnand %p483_p13, %p477_p10 }
  0x45   :  { %351 = vmatpush3.bf16.msra.mxu0 %v395_v5  ;;  %371 = vmatpush3.bf16.msra.mxu1 %v403_v10 }
  0x46   :  { %352 = vmatprep.subr.bf16.mxu0 %v509_v0  ;;  %372 = vmatprep.subr.bf16.mxu1 %v509_v0 }
  0x49   :  { %353 = vmatpush3.bf16.msra.mxu0 %v396_v7  ;;  %373 = vmatpush3.bf16.msra.mxu1 %v404_v12 }
  0x4a   :  { %354 = vmatprep.subr.bf16.mxu0 %v509_v0  ;;  %374 = vmatprep.subr.bf16.mxu1 %v509_v0 }
  0x4d   :  { %355 = vmatpush3.bf16.msra.mxu0 %v397_v9  ;;  %375 = vmatpush3.bf16.msra.mxu1 %v405_v14 }
  0x4e   :  { %356 = vmatprep.subr.bf16.mxu0 %v509_v0  ;;  %376 = vmatprep.subr.bf16.mxu1 %v509_v0 }
  0x51   :  { %357 = vmatpush3.bf16.msra.mxu0 %v398_v11  ;;  %377 = vmatpush3.bf16.msra.mxu1 %v406_v16 }
  0x52   :  { %358 = vmatprep.subr.bf16.mxu0 %v509_v0  ;;  %378 = vmatprep.subr.bf16.mxu1 %v509_v0 }
  0x55   :  { %359 = vmatpush3.bf16.msra.mxu0 %v399_v13  ;;  %379 = vmatpush3.bf16.msra.mxu1 %v407_v17 }
  0x58   :  { %361 = vmatmul.mubr.bf16.vlgmr.msra.gmra.mrb[0].mxu0 %v61_v15 }
 0x12b   :  { %v167_v19 = vpop.f32.mrb[0].mxu0 }
 0x12c   :  { %v168_v20 = vadd.f32 %v308_v18, %v167_v19  ;;  %v362_v21 = vpop.f32.mrb[1].mxu0 }
 0x12d   :  { %v170_v22 = vpop.f32.mrb[2].mxu0 }
 0x12e   :  { %v173_v23 = vmax.f32 %v168_v20, 0.0  ;;  %v363_v24 = vpop.f32.mrb[3].mxu0 }
 0x130   :  { %v174_v25 = vpack.c.bf16 %v173_v23, %v173_v23 }
 0x132   :  { %381 = vmatmul.mubr.bf16.vlgmr.msra.gmra.mrb[0].mxu1 %v174_v25 }
 0x205   :  { %v280_v27 = vpop.f32.mrb[0].mxu1 }
 0x206   :  { %v281_v28 = vadd.f32 %v317_v26, %v280_v27  ;;  %v382_v29 = vpop.f32.mrb[1].mxu1 }
 0x207   :  { %v283_v30 = vpop.f32.mrb[2].mxu1 }
 0x208   :  { %v286_v31 = vmul.f32 0.5, %v281_v28  ;;  %v383_v32 = vpop.f32.mrb[3].mxu1 }
 0x20a   :  { %408 = vtanh.f32 %v286_v31 }
 0x214   :  { %v409_v33 = vpop.eup %408 }
 0x215   :  { %v288_v34 = vadd.f32 1.0, %v409_v33 }
 0x217   :  { %v289_v35 = vmul.f32 0.5, %v288_v34 }
 0x219   :  { %v290_v36 = vpack.c.bf16 %v289_v35, %v289_v35 }
 0x21b   :  { %291 = vst [vmem:[#allocation8] sm:$0xf] %v290_v36 }
 0x21c   :  { %487 = shalt.err (!%p484_p0)
}
 0x21d   :  { %s488_s10 = scalar_lea.hbm %s607_s5, 64 }
 0x21e   :  { %p489_p1 = scmp.ne.s32.totalorder %s607_s5, %s488_s10  ;;  %p492_p2 = scmp.lt.u32.totalorder %s488_s10, %s607_s5 }
 0x220   :  { %p494_p3 = pnand %p492_p2, %p489_p1 }
 0x222   :  { %497 = shalt.err (!%p494_p3)
}
 0x223   :  { %301 = dma.vmem_to_hbm [thread:$0]  %s299_s7, 64, %s607_s5, [#allocation4]  }
 0x224   :  { %502 = dma.done.wait [#allocation4], 64  }
 0x225   :  { %503 = vsyncadd [#allocation4], 4294967232 }
 0x226   :  { %305 = vsyncpa [#allocation3], 1 }
 0x227   :  { %306 = vsyncpa [#allocation6], 1 }
 0x228   :  { %307 = vsyncpa [#allocation4], 1 }

</bundles_post_ra>
